<compile_context>
chip_gen: v7x
topology: tpu7x:2x2x1
jax: 0.10.0
libtpu: 0.0.40
codegen_flags: <defaults>
</compile_context>

<pallas_src>
import jax
import jax.numpy as jnp
from jax.experimental import pallas as pl
from jax.experimental.pallas import tpu as pltpu


def _round_up(x: int, m: int) -> int:
    return ((x + m - 1) // m) * m


def _softmax_rows_kernel(x_ref, o_ref):
    # x_ref/o_ref: (rt, L) VMEM tiles; softmax over the last (lane) axis.
    # Compute in f32 (safe on v5e, which has no bf16 VPU/EUP).
    x = x_ref[...].astype(jnp.float32)
    m = jnp.max(x, axis=-1, keepdims=True)
    e = jnp.exp(x - m)
    s = jnp.sum(e, axis=-1, keepdims=True)
    # Exact reciprocal on the (rt, 1) per-row sum (negligible cost); the
    # approx=True EUP path cost output parity with the reference softmax.
    o_ref[...] = (e * (1.0 / s)).astype(o_ref.dtype)


def _vmem_capacity_bytes() -> int:
    # Generation-aware when running on a real TPU (128 MiB v5e/v6e, 64 MiB v7x);
    # conservative fallback when the query is unavailable (e.g. interpret mode).
    try:
        return int(pltpu.get_tpu_info().vmem_capacity_bytes)
    except Exception:
        return 64 << 20


def channel_norm(featmap: jax.Array, *, target_block_bytes: int = 4 << 20) -> jax.Array:
    """Pallas equivalent of ChannelNorm.forward.

    featmap: (n, c, h, w) -> returns (n, c, h*w) softmaxed over the last dim.
    """
    n, c, h, w = featmap.shape
    rows, L = n * c, h * w
    dtype = featmap.dtype
    itemsize = jnp.dtype(dtype).itemsize
    # Sublane packing multiple: 8 for 32-bit, 16 for bf16/f16, 32 for 8-bit.
    sub = max(8, 32 // max(itemsize, 1))

    # No padding / no output slice: avoids 1-2 extra full HBM passes.
    x2d = featmap.reshape(rows, L)

    # --- VMEM footprint per tile-row:
    #   2x double-buffered (input + output) blocks  -> 4 * io bytes
    #   ~3 full-tile f32 temporaries inside the body -> 3 * 4 bytes/elem
    row_io_bytes = L * itemsize
    row_tmp_bytes = L * 4
    per_row_vmem = 4 * row_io_bytes + 3 * row_tmp_bytes
    headroom = 2 << 20
    vmem_cap = (_vmem_capacity_bytes() * 3) // 4  # stay under ~75% of physical VMEM

    # --- Row-tile selection: big (multiple-of-`sub`) tiles amortize the
    # ~0.35us per-grid-step overhead, bounded by the VMEM budget and the
    # (rounded-up) row count. Never below `sub`.
    rt_target = max(sub, (target_block_bytes // max(row_io_bytes, 1)) // sub * sub)
    rt_cap = max(sub, ((vmem_cap - headroom) // max(per_row_vmem, 1)) // sub * sub)
    rt = max(sub, min(rt_target, rt_cap, _round_up(rows, sub)))

    # Partial last block: input tail rows read whatever is there (rows are
    # independent, results discarded), output tail stores are masked by Pallas.
    grid = (pl.cdiv(rows, rt),)

    vmem_needed = rt * per_row_vmem + headroom
    # Never hand the compiler less than the tiles need; rt was already shrunk
    # to respect the capacity cap whenever possible.
    vmem_limit = int(max(vmem_needed, 16 << 20))
    # TODO(synk): for very large h*w (rt == sub still over the VMEM budget) add
    # an L-tiled online-softmax path (second "arbitrary" grid axis, (rt,1)
    # running max/sum scratch, finalize rescale) so the kernel fits v7x VMEM.

    out2d = pl.pallas_call(
        _softmax_rows_kernel,
        out_shape=jax.ShapeDtypeStruct((rows, L), dtype),
        grid_spec=pltpu.PrefetchScalarGridSpec(
            num_scalar_prefetch=0,
            grid=grid,
            in_specs=[pl.BlockSpec((rt, L), lambda i: (i, 0))],
            out_specs=pl.BlockSpec((rt, L), lambda i: (i, 0)),
        ),
        compiler_params=pltpu.CompilerParams(
            dimension_semantics=("parallel",),
            vmem_limit_bytes=vmem_limit,
        ),
    )(x2d)

    return out2d.reshape(n, c, L)


if __name__ == "__main__":
    key = jax.random.PRNGKey(0)

    # Main shape from the module spec.
    n, c, h, w = 2, 4, 16, 16
    x = jax.random.normal(key, (n, c, h, w), dtype=jnp.float32)
    out = channel_norm(x)
    jax.block_until_ready(out)
    ref = jax.nn.softmax(x.reshape(n, c, h * w), axis=-1)
    assert out.shape == (n, c, h * w)
    assert jnp.allclose(out, ref, atol=1e-5, rtol=1e-5), "mismatch on (2,4,16,16)"

    # Ragged path: rows (n*c=3) not a multiple of 8, h*w=100 not a multiple of 128.
    n2, c2, h2, w2 = 1, 3, 10, 10
    x2 = jax.random.normal(jax.random.PRNGKey(1), (n2, c2, h2, w2), dtype=jnp.float32)
    out2 = channel_norm(x2)
    jax.block_until_ready(out2)
    ref2 = jax.nn.softmax(x2.reshape(n2, c2, h2 * w2), axis=-1)
    assert out2.shape == (n2, c2, h2 * w2)
    assert jnp.allclose(out2, ref2, atol=1e-5, rtol=1e-5), "mismatch on (1,3,10,10)"

    print("KERNEL_OK")
</pallas_src>

<mosaic_0001>
module attributes {stable_mosaic.version = 11 : i64} {
  func.func @_softmax_rows_kernel(%arg0: i32, %arg1: memref<8x256xf32, #tpu.memory_space<vmem>>, %arg2: memref<8x256xf32, #tpu.memory_space<vmem>>) attributes {dimension_semantics = [#tpu.dimension_semantics<parallel>], iteration_bounds = array<i64: 1>, scalar_prefetch = 0 : i64, scratch_operands = 0 : i64, tpu.core_type = #tpu.core_type<tc>, window_params = [{transform_indices = @transform_0, window_bounds = array<i64: 8, 256>}, {transform_indices = @transform_1, window_bounds = array<i64: 8, 256>}]} {
    %c0 = arith.constant 0 : index
    %c0_0 = arith.constant 0 : index
    %0 = vector.load %arg1[%c0, %c0_0] : memref<8x256xf32, #tpu.memory_space<vmem>>, vector<8x256xf32>
    %cst = arith.constant dense<0xFF800000> : vector<8xf32>
    %1 = vector.multi_reduction <maximumf>, %0, %cst [1] : vector<8x256xf32> to vector<8xf32>
    %2 = vector.shape_cast %1 : vector<8xf32> to vector<8x1xf32>
    %3 = vector.broadcast %2 : vector<8x1xf32> to vector<8x256xf32>
    %4 = arith.subf %0, %3 : vector<8x256xf32>
    %5 = math.exp %4 : vector<8x256xf32>
    %cst_1 = arith.constant dense<0.000000e+00> : vector<8xf32>
    %6 = vector.multi_reduction <add>, %5, %cst_1 [1] : vector<8x256xf32> to vector<8xf32>
    %7 = vector.shape_cast %6 : vector<8xf32> to vector<8x1xf32>
    %cst_2 = arith.constant 1.000000e+00 : f32
    %8 = vector.broadcast %cst_2 : f32 to vector<8x1xf32>
    %9 = arith.divf %8, %7 : vector<8x1xf32>
    %10 = vector.broadcast %9 : vector<8x1xf32> to vector<8x256xf32>
    %11 = arith.mulf %5, %10 : vector<8x256xf32>
    %c0_3 = arith.constant 0 : index
    %c0_4 = arith.constant 0 : index
    %12 = vector.load %arg2[%c0_3, %c0_4] : memref<8x256xf32, #tpu.memory_space<vmem>>, vector<8x256xf32>
    tpu.vector_store %arg2[%c0_3, %c0_4], %11 {strides = array<i32>} : memref<8x256xf32, #tpu.memory_space<vmem>>, vector<8x256xf32>,
    return
  }
  func.func @transform_0(%arg0: i32) -> (i32, i32) {
    %c0_i32 = arith.constant 0 : i32
    %c0_i32_0 = arith.constant 0 : i32
    return %arg0, %c0_i32 : i32, i32
  }
  func.func @transform_1(%arg0: i32) -> (i32, i32) {
    %c0_i32 = arith.constant 0 : i32
    %c0_i32_0 = arith.constant 0 : i32
    return %arg0, %c0_i32 : i32, i32
  }
}

</mosaic_0001>

<bundles_post_ra>
// kernel: tpu_custom_call.1
= control target key start
LH: loop header
LB: loop body
LE: loop exit
PB: predicated region body
PF: predicated region fallthrough
CT: control target
= control target key end

     0   :  { %6 = vsyncpa [#allocation3], 0  ;;  %s148_s0 = inlined_call_operand.hbm [shape: f32[8,256], index: 0, kind: input, shape index: {}]   ;;  %s149_s1 = inlined_call_operand.hbm [shape: f32[8,256], index: 1, kind: output, shape index: {}]  }
   0x1   :  { %7 = vsyncpa [#allocation4], 0  ;;  %s112_s6 = smov [#allocation2]   ;;  %s64_s10 = scalar_lea.hbm %s148_s0, 256 }
   0x2   :  { %s14_s7 = sshll.u32 %s112_s6, 4  ;;  %p65_p0 = scmp.ne.s32.totalorder %s148_s0, %s64_s10  ;;  %s15_s7 = int_to_ptr.vmem [resolvable:$true] %s14_s7 }
   0x3   :  { %p68_p1 = scmp.lt.u32.totalorder %s64_s10, %s148_s0 }
   0x5   :  { %p70_p2 = pnand %p68_p1, %p65_p0 }
   0x7   :  { %73 = shalt.err (!%p70_p2)
}
   0x8   :  { %s74_s15 = scalar_lea.vmem %s15_s7, 256  ;;  %p79_p4 = scmp.lt.s32.totalorder %s15_s7, %s15_s7 }
   0x9   :  { %p75_p3 = scmp.ne.s32.totalorder %s15_s7, %s74_s15  ;;  %p80_p5 = scmp.lt.s32.totalorder %s74_s15, %s74_s15 }
   0xb   :  { %p81_p6 = por %p80_p5, %p79_p4 }
   0xd   :  { %p82_p7 = pnand %p81_p6, %p75_p3 }
   0xf   :  { %85 = shalt.err (!%p82_p7)
}
  0x10   :  { %17 = dma.hbm_to_vmem [thread:$0]  %s148_s0, 256, %s15_s7, [#allocation3]  }
  0x11   :  { %108 = dma.done.wait [#allocation3], 256  }
  0x12   :  { %109 = vsyncadd [#allocation3], 4294967040  ;;  %v21_v0 = vld [vmem:[#allocation2] sm:$0xff]  ;;  %v22_v1 = vld [vmem:[#allocation2 + $0x8] sm:$0xff]  ;;  %s113_s0 = smov [#allocation5]  }
  0x13   :  { %v23_v2 = vmax.f32 %v21_v0, %v22_v1  ;;  %s47_s18 = sshll.u32 %s113_s0, 4  ;;  %s48_s18 = int_to_ptr.vmem [resolvable:$true] %s47_s18 }
  0x14   :  { %s86_s19 = scalar_lea.vmem %s48_s18, 256  ;;  %p91_p9 = scmp.lt.s32.totalorder %s48_s18, %s48_s18 }
  0x15   :  { %24 = vmax.xlane.f32.xlu0 %v23_v2  ;;  %p87_p8 = scmp.ne.s32.totalorder %s48_s18, %s86_s19  ;;  %p92_p10 = scmp.lt.s32.totalorder %s86_s19, %s86_s19 }
  0x17   :  { %p93_p11 = por %p92_p10, %p91_p9 }
  0x19   :  { %p94_p12 = pnand %p93_p11, %p87_p8 }
  0xa2   :  { %v25_v3 = vpop.xlane.xlu0 %24 }
  0xa3   :  { %v26_v4 = vsub.f32 %v21_v0, %v25_v3  ;;  %v27_v5 = vsub.f32 %v22_v1, %v25_v3 }
  0xa5   :  { %v28_v6 = vmul.f32 1.442695, %v26_v4  ;;  %v30_v7 = vmul.f32 1.442695, %v27_v5 }
  0xa7   :  { %58 = vpow2.f32 %v28_v6 }
  0xa8   :  { %60 = vpow2.f32 %v30_v7 }
  0xb1   :  { %v59_v8 = vpop.eup %58 }
  0xb2   :  { %v61_v9 = vpop.eup %60 }
  0xb3   :  { %v32_v10 = vadd.f32 %v61_v9, %v59_v8 }
  0xb5   :  { %33 = vadd.xlane.f32.xlu0 %v32_v10 }
 0x142   :  { %v34_v11 = vpop.xlane.xlu0 %33 }
 0x143   :  { %62 = vrcp.f32 %v34_v11 }
 0x14d   :  { %v63_v12 = vpop.eup %62 }
 0x14e   :  { %v37_v13 = vmul.f32 %v63_v12, %v59_v8  ;;  %v38_v14 = vmul.f32 %v63_v12, %v61_v9 }
 0x150   :  { %39 = vst [vmem:[#allocation5] sm:$0xff] %v37_v13  ;;  %40 = vst [vmem:[#allocation5 + $0x8] sm:$0xff] %v38_v14 }
 0x151   :  { %97 = shalt.err (!%p94_p12)
}
 0x152   :  { %s98_s22 = scalar_lea.hbm %s149_s1, 256 }
 0x153   :  { %p99_p13 = scmp.ne.s32.totalorder %s149_s1, %s98_s22  ;;  %p102_p0 = scmp.lt.u32.totalorder %s98_s22, %s149_s1 }
 0x155   :  { %p104_p1 = pnand %p102_p0, %p99_p13 }
 0x157   :  { %107 = shalt.err (!%p104_p1)
}
 0x158   :  { %50 = dma.vmem_to_hbm [thread:$0]  %s48_s18, 256, %s149_s1, [#allocation4]  }
 0x159   :  { %110 = dma.done.wait [#allocation4], 256  }
 0x15a   :  { %111 = vsyncadd [#allocation4], 4294967040 }
 0x15b   :  { %54 = vsyncpa [#allocation3], 1 }
 0x15c   :  { %55 = vsyncpa [#allocation4], 1 }

</bundles_post_ra>
